<compile_context>
chip_gen: v7x
topology: tpu7x:2x2x1
jax: 0.10.0
libtpu: 0.0.40
codegen_flags: <defaults>
</compile_context>

<pallas_src>
import functools

import numpy as np
import jax
import jax.numpy as jnp
from jax import lax
from jax.experimental import pallas as pl
from jax.experimental.pallas import tpu as pltpu

_EPS = 1e-4  # get_norm_layer(..., 'bn') -> nn.BatchNorm2d(channels, eps=0.0001)


# ----------------------------- in-kernel helpers -----------------------------

def _elu(x):
    # ELU(alpha=1): x if x > 0 else exp(x) - 1 (clamp exp arg for safety).
    # (exp-1 kept instead of expm1 for guaranteed Mosaic lowering.)
    return jnp.where(x > 0, x, jnp.exp(jnp.minimum(x, 0.0)) - 1.0)


def _write_taps(a, col_ref, masks, shifts, c, hw, b):
    """Write the 9 shifted 3x3 taps of image `b`'s activation `a` (c, hw) into
    the bf16 im2col slab col_ref (9*c, B*hw) at lane offset b*hw.

    Roll/mask math stays f32 (v5e has no bf16 VALU); the bf16 cast happens at
    the store, halving slab vst bytes.  The centre tap (shift == 0) has an
    all-ones mask and is stored directly."""
    lo = b * hw
    for t, s in enumerate(shifts):
        if s == 0:
            val = a
        else:
            val = pltpu.roll(a, s, axis=1) * masks[t]
        col_ref[t * c:(t + 1) * c, lo:lo + hw] = val.astype(jnp.bfloat16)


# --------------------------------- kernels ------------------------------------

def _pass1_kernel(*refs, shifts, cin, bttl, hw, bimg, with_branch):
    # pass 1: ELU(BN1(x)) -> fused conv1 (bottleneck rows [+ skip rows])
    #         + per-block BN2 partial moments of the bottleneck output.
    if with_branch:
        (x_ref, ss_ref, m_ref, w_ref, b_ref,
         yb_ref, ys_ref, mom_ref, col_ref) = refs
    else:
        (x_ref, ss_ref, m_ref, w_ref, b_ref,
         yb_ref, mom_ref, col_ref) = refs

    scale, shift = ss_ref[:, 0:1], ss_ref[:, 1:2]          # (cin, 1) each
    masks = m_ref[...]                                      # (9, 1, hw) f32

    for b in range(bimg):                                   # static unroll
        a = _elu(x_ref[b] * scale + shift)                  # (cin, hw) f32
        _write_taps(a, col_ref, masks, shifts, cin, hw, b)

    # ONE fused matmul for bottleneck + skip rows; bf16 operands, f32 acc.
    y = jnp.dot(w_ref[...], col_ref[...],
                preferred_element_type=jnp.float32) + b_ref[...]

    yb = y[:bttl]                                           # (bttl, B*hw)
    for b in range(bimg):
        yb_ref[b] = yb[:, b * hw:(b + 1) * hw]              # lane-dense stores
    if with_branch:
        ys = y[bttl:]                                       # (cout, B*hw)
        for b in range(bimg):
            ys_ref[b] = ys[:, b * hw:(b + 1) * hw]

    # BN2 partial moments over this block's B*hw positions (avoids an extra
    # full HBM pass over yb between the two pallas_calls).
    s = jnp.sum(yb, axis=1, keepdims=True)
    q = jnp.sum(yb * yb, axis=1, keepdims=True)
    mom_ref[0] = jnp.concatenate([s, q], axis=1)            # (bttl, 2)


def _pass2_kernel(yb_ref, ss_ref, m_ref, w_ref, b_ref, r_ref, out_ref, col_ref,
                  *, shifts, cb, hw, bimg):
    # pass 2: ELU(BN2(bottleneck)) -> conv2 -> + residual
    scale, shift = ss_ref[:, 0:1], ss_ref[:, 1:2]
    masks = m_ref[...]
    for b in range(bimg):
        a = _elu(yb_ref[b] * scale + shift)                 # (bttl, hw) f32
        _write_taps(a, col_ref, masks, shifts, cb, hw, b)
    y = jnp.dot(w_ref[...], col_ref[...],
                preferred_element_type=jnp.float32) + b_ref[...]
    for b in range(bimg):
        out_ref[b] = y[:, b * hw:(b + 1) * hw] + r_ref[b]   # lane-dense stores


# ------------------------------ wrapper helpers --------------------------------

def _conv_taps(H, W):
    """Static lane-roll shifts and {0,1} edge masks for a 3x3 pad-1 conv."""
    HW = H * W
    hh = np.arange(H)[:, None]
    ww = np.arange(W)[None, :]
    shifts, masks = [], []
    for dy in range(3):
        for dx in range(3):
            oy, ox = dy - 1, dx - 1
            valid = ((hh + oy >= 0) & (hh + oy < H) &
                     (ww + ox >= 0) & (ww + ox < W))
            masks.append(valid.reshape(1, HW).astype(np.float32))
            shifts.append(int((-(oy * W + ox)) % HW))
    return tuple(shifts), jnp.asarray(np.stack(masks, axis=0))   # (9, 1, HW)


def _bn_scale_shift(mean, var, gamma, beta):
    """Fold BN batch stats + affine into packed per-channel (C, 2) scale/shift."""
    scale = gamma.reshape(-1) * lax.rsqrt(var + _EPS)
    shift = beta.reshape(-1) - mean * scale
    return jnp.stack([scale, shift], axis=1).astype(jnp.float32)


def _pick_image_block(n, target=8):
    """Largest divisor of n that is <= target while keeping the grid >= 2
    (v7x has two TensorCores splitting the parallel grid axis)."""
    best = 1
    for b in range(1, n + 1):
        if b > target:
            break
        if n % b == 0 and (n // b >= 2 or n == 1):
            best = b
    return best


def _vmem_limit_bytes():
    """Chip-aware scoped-VMEM cap: generous on v5e/v6e (128 MiB VMEM),
    conservative on v7x (64 MiB).  Falls back to a universally safe value."""
    try:
        cap = int(pltpu.get_tpu_info().vmem_capacity_bytes)
        return min(100 * 1024 * 1024, (cap * 3) // 4)
    except Exception:
        return 32 * 1024 * 1024


def _cost(flops, transcendentals, nbytes):
    return pl.CostEstimate(flops=int(flops), transcendentals=int(transcendentals),
                           bytes_accessed=int(nbytes))


# -------------------------------- forward -------------------------------------

def resblock_forward(x_nchw, params, channel_in, channel_out):
    g1, b1, w1, c1b, g2, b2, w2, c2b = params
    skip = channel_in == channel_out
    bttl = channel_in // 2
    first_out = bttl if skip else bttl + channel_out
    n, cin, H, W = x_nchw.shape
    HW = H * W

    # C-major spatial-flat layout: free reshape, no HBM transpose round trip.
    x2 = x_nchw.reshape(n, cin, HW).astype(jnp.float32)

    shifts, masks = _conv_taps(H, W)

    # Hoisted BN1 batch statistics (global over N,H,W; two-pass variance).
    ss1 = _bn_scale_shift(jnp.mean(x2, axis=(0, 2)), jnp.var(x2, axis=(0, 2)),
                          g1, b1)                                     # (cin, 2)

    # Fused conv1 weight: (first_out, 9*Cin) bf16, bias (first_out, 1) f32.
    w1_mat = w1.reshape(9 * cin, first_out).T.astype(jnp.bfloat16)
    b1v = c1b.reshape(first_out, 1).astype(jnp.float32)

    # B images per grid step (B divides N; grid stays >= 2 where possible).
    B = _pick_image_block(n)
    nblk = n // B
    BHW = B * HW

    img_blk = lambda c: pl.BlockSpec((B, c, HW), lambda i: (i, 0, 0))
    full2d = lambda r, c: pl.BlockSpec((r, c), lambda i: (0, 0))
    msk_spec = pl.BlockSpec((9, 1, HW), lambda i: (0, 0, 0))
    mom_spec = pl.BlockSpec((1, bttl, 2), lambda i: (i, 0, 0))

    cparams = pltpu.CompilerParams(
        dimension_semantics=("parallel",),            # image blocks independent
        vmem_limit_bytes=_vmem_limit_bytes())

    cost1 = _cost(
        flops=2 * first_out * 9 * cin * HW * n,
        transcendentals=n * cin * HW,
        nbytes=4 * n * HW * (cin + bttl + (0 if skip else channel_out))
               + 2 * first_out * 9 * cin + 4 * nblk * bttl * 2)

    kernel1 = functools.partial(_pass1_kernel, shifts=shifts, cin=cin, bttl=bttl,
                                hw=HW, bimg=B, with_branch=not skip)
    in_specs1 = [img_blk(cin), full2d(cin, 2), msk_spec,
                 full2d(first_out, 9 * cin), full2d(first_out, 1)]

    if skip:
        yb, moments = pl.pallas_call(
            kernel1, grid=(nblk,),
            in_specs=in_specs1,
            out_specs=(img_blk(bttl), mom_spec),
            out_shape=(jax.ShapeDtypeStruct((n, bttl, HW), jnp.float32),
                       jax.ShapeDtypeStruct((nblk, bttl, 2), jnp.float32)),
            scratch_shapes=[pltpu.VMEM((9 * cin, BHW), jnp.bfloat16)],
            compiler_params=cparams, cost_estimate=cost1,
        )(x2, ss1, masks, w1_mat, b1v)
        resid = x2                                        # identity skip
    else:
        yb, resid, moments = pl.pallas_call(
            kernel1, grid=(nblk,),
            in_specs=in_specs1,
            out_specs=(img_blk(bttl), img_blk(channel_out), mom_spec),
            out_shape=(jax.ShapeDtypeStruct((n, bttl, HW), jnp.float32),
                       jax.ShapeDtypeStruct((n, channel_out, HW), jnp.float32),
                       jax.ShapeDtypeStruct((nblk, bttl, 2), jnp.float32)),
            scratch_shapes=[pltpu.VMEM((9 * cin, BHW), jnp.bfloat16)],
            compiler_params=cparams, cost_estimate=cost1,
        )(x2, ss1, masks, w1_mat, b1v)

    # BN2 batch statistics from the pass-1 partial moments (no HBM re-read of
    # yb).  One-pass variance, clamped at 0 (acceptable for f32 activations).
    cnt = float(n * HW)
    msum = jnp.sum(moments, axis=0)                       # (bttl, 2)
    m2 = msum[:, 0] / cnt
    v2 = jnp.maximum(msum[:, 1] / cnt - m2 * m2, 0.0)
    ss2 = _bn_scale_shift(m2, v2, g2, b2)                 # (bttl, 2)

    w2_mat = w2.reshape(9 * bttl, channel_out).T.astype(jnp.bfloat16)
    b2v = c2b.reshape(channel_out, 1).astype(jnp.float32)

    cost2 = _cost(
        flops=2 * channel_out * 9 * bttl * HW * n,
        transcendentals=n * bttl * HW,
        nbytes=4 * n * HW * (bttl + 2 * channel_out) + 2 * channel_out * 9 * bttl)

    out = pl.pallas_call(
        functools.partial(_pass2_kernel, shifts=shifts, cb=bttl, hw=HW, bimg=B),
        grid=(nblk,),
        in_specs=[img_blk(bttl), full2d(bttl, 2), msk_spec,
                  full2d(channel_out, 9 * bttl), full2d(channel_out, 1),
                  img_blk(channel_out)],
        out_specs=img_blk(channel_out),
        out_shape=jax.ShapeDtypeStruct((n, channel_out, HW), jnp.float32),
        scratch_shapes=[pltpu.VMEM((9 * bttl, BHW), jnp.bfloat16)],
        compiler_params=cparams, cost_estimate=cost2,
    )(yb, ss2, masks, w2_mat, b2v, resid)

    return out.reshape(n, channel_out, H, W)              # free reshape to NCHW


# --------------------------- params / reference --------------------------------

def init_params(key, channel_in, channel_out):
    skip = channel_in == channel_out
    bttl = channel_in // 2
    first_out = bttl if skip else bttl + channel_out
    ks = jax.random.split(key, 8)
    g1 = 1.0 + 0.1 * jax.random.normal(ks[0], (1, channel_in), jnp.float32)
    b1 = 0.1 * jax.random.normal(ks[1], (1, channel_in), jnp.float32)
    w1 = 0.2 * jax.random.normal(ks[2], (3, 3, channel_in, first_out), jnp.float32)
    c1b = 0.1 * jax.random.normal(ks[3], (1, first_out), jnp.float32)
    g2 = 1.0 + 0.1 * jax.random.normal(ks[4], (1, bttl), jnp.float32)
    b2 = 0.1 * jax.random.normal(ks[5], (1, bttl), jnp.float32)
    w2 = 0.2 * jax.random.normal(ks[6], (3, 3, bttl, channel_out), jnp.float32)
    c2b = 0.1 * jax.random.normal(ks[7], (1, channel_out), jnp.float32)
    return (g1, b1, w1, c1b, g2, b2, w2, c2b)


def resblock_ref(x_nchw, params, channel_in, channel_out):
    """Pure-JAX f32 reference (same math, XLA conv) for correctness checking."""
    g1, b1, w1, c1b, g2, b2, w2, c2b = params
    skip = channel_in == channel_out
    bttl = channel_in // 2
    x_in = jnp.transpose(x_nchw, (0, 2, 3, 1)).astype(jnp.float32)

    def bn(x, g, b):
        m = jnp.mean(x, axis=(0, 1, 2), keepdims=True)
        v = jnp.mean((x - m) ** 2, axis=(0, 1, 2), keepdims=True)
        return (x - m) * lax.rsqrt(v + _EPS) * g.reshape(1, 1, 1, -1) \
            + b.reshape(1, 1, 1, -1)

    def elu(x):
        return jnp.where(x > 0, x, jnp.exp(jnp.minimum(x, 0.0)) - 1.0)

    def conv(x, w, bb):
        y = lax.conv_general_dilated(
            x, w, window_strides=(1, 1), padding="SAME",
            dimension_numbers=("NHWC", "HWIO", "NHWC"))
        return y + bb.reshape(1, 1, 1, -1)

    x = elu(bn(x_in, g1, b1))
    x_cat = conv(x, w1, c1b)
    x = x_cat[..., :bttl]
    sk = x_in if skip else x_cat[..., bttl:]
    x = elu(bn(x, g2, b2))
    y = conv(x, w2, c2b)
    return jnp.transpose(y + sk, (0, 3, 1, 2))


# ---------------------------------- main ---------------------------------------

if __name__ == "__main__":
    key = jax.random.PRNGKey(0)
    kx, kp1, kp2 = jax.random.split(key, 3)

    # PyTorch-style NCHW input, small shapes.
    x = jax.random.normal(kx, (2, 4, 16, 16), jnp.float32)

    # Case 1: channel_in == channel_out -> identity skip.
    params = init_params(kp1, 4, 4)
    out = resblock_forward(x, params, 4, 4)
    jax.block_until_ready(out)
    ref = resblock_ref(x, params, 4, 4)
    assert out.shape == (2, 4, 16, 16)
    # Kernel uses bf16 MXU operands (f32 accumulation) vs an all-f32 reference,
    # so the tolerance is loosened accordingly.
    assert bool(jnp.allclose(out, ref, atol=3e-2, rtol=3e-2)), \
        float(jnp.max(jnp.abs(out - ref)))

    # Case 2: channel_in != channel_out -> skip taken from conv1 output tail.
    params2 = init_params(kp2, 4, 8)
    out2 = resblock_forward(x, params2, 4, 8)
    jax.block_until_ready(out2)
    ref2 = resblock_ref(x, params2, 4, 8)
    assert out2.shape == (2, 8, 16, 16)
    assert bool(jnp.allclose(out2, ref2, atol=3e-2, rtol=3e-2)), \
        float(jnp.max(jnp.abs(out2 - ref2)))

    print("KERNEL_OK")
</pallas_src>

<mosaic_0001>
module attributes {stable_mosaic.version = 11 : i64} {
  func.func @_pass1_kernel(%arg0: i32, %arg1: memref<1x4x256xf32, #tpu.memory_space<vmem>>, %arg2: memref<4x2xf32, #tpu.memory_space<vmem>>, %arg3: memref<9x1x256xf32, #tpu.memory_space<vmem>>, %arg4: memref<2x36xbf16, #tpu.memory_space<vmem>>, %arg5: memref<2x1xf32, #tpu.memory_space<vmem>>, %arg6: memref<1x2x256xf32, #tpu.memory_space<vmem>>, %arg7: memref<1x2x2xf32, #tpu.memory_space<vmem>>, %arg8: memref<36x256xbf16, #tpu.memory_space<vmem>>) attributes {dimension_semantics = [#tpu.dimension_semantics<parallel>], iteration_bounds = array<i64: 2>, scalar_prefetch = 0 : i64, scratch_operands = 1 : i64, tpu.core_type = #tpu.core_type<tc>, window_params = [{transform_indices = @transform_0, window_bounds = array<i64: 1, 4, 256>}, {pipeline_mode = #tpu.pipeline_mode<synchronous>, transform_indices = @transform_1, window_bounds = array<i64: 4, 2>}, {pipeline_mode = #tpu.pipeline_mode<synchronous>, transform_indices = @transform_2, window_bounds = array<i64: 9, 1, 256>}, {pipeline_mode = #tpu.pipeline_mode<synchronous>, transform_indices = @transform_3, window_bounds = array<i64: 2, 36>}, {pipeline_mode = #tpu.pipeline_mode<synchronous>, transform_indices = @transform_4, window_bounds = array<i64: 2, 1>}, {transform_indices = @transform_5, window_bounds = array<i64: 1, 2, 256>}, {transform_indices = @transform_6, window_bounds = array<i64: 1, 2, 2>}]} {
    %c0 = arith.constant 0 : index
    %c0_0 = arith.constant 0 : index
    %0 = vector.load %arg2[%c0, %c0_0] : memref<4x2xf32, #tpu.memory_space<vmem>>, vector<4x1xf32>
    %c0_1 = arith.constant 0 : index
    %c1 = arith.constant 1 : index
    %1 = vector.load %arg2[%c0_1, %c1] : memref<4x2xf32, #tpu.memory_space<vmem>>, vector<4x1xf32>
    %c0_2 = arith.constant 0 : index
    %c0_3 = arith.constant 0 : index
    %c0_4 = arith.constant 0 : index
    %2 = vector.load %arg3[%c0_2, %c0_3, %c0_4] : memref<9x1x256xf32, #tpu.memory_space<vmem>>, vector<9x1x256xf32>
    %c0_5 = arith.constant 0 : index
    %c0_6 = arith.constant 0 : index
    %c0_7 = arith.constant 0 : index
    %3 = vector.load %arg1[%c0_5, %c0_6, %c0_7] : memref<1x4x256xf32, #tpu.memory_space<vmem>>, vector<1x4x256xf32>
    %4 = vector.shape_cast %3 : vector<1x4x256xf32> to vector<4x256xf32>
    %5 = vector.broadcast %0 : vector<4x1xf32> to vector<4x256xf32>
    %6 = arith.mulf %4, %5 : vector<4x256xf32>
    %7 = vector.broadcast %1 : vector<4x1xf32> to vector<4x256xf32>
    %8 = arith.addf %6, %7 : vector<4x256xf32>
    %cst = arith.constant 0.000000e+00 : f32
    %9 = vector.broadcast %cst : f32 to vector<4x256xf32>
    %10 = arith.cmpf ogt, %8, %9 : vector<4x256xf32>
    %cst_8 = arith.constant 0.000000e+00 : f32
    %11 = vector.broadcast %cst_8 : f32 to vector<4x256xf32>
    %12 = arith.minimumf %8, %11 : vector<4x256xf32>
    %13 = math.exp %12 : vector<4x256xf32>
    %cst_9 = arith.constant 1.000000e+00 : f32
    %14 = vector.broadcast %cst_9 : f32 to vector<4x256xf32>
    %15 = arith.subf %13, %14 : vector<4x256xf32>
    %16 = arith.select %10, %8, %15 : vector<4x256xi1>, vector<4x256xf32>
    %c17_i32 = arith.constant 17 : i32
    %17 = tpu.dynamic_rotate %16 by %c17_i32 dim 1 : vector<4x256xf32>, i32 -> vector<4x256xf32>
    %18 = vector.extract_strided_slice %2 {offsets = [0, 0, 0], sizes = [1, 1, 256], strides = [1, 1, 1]} : vector<9x1x256xf32> to vector<1x1x256xf32>
    %19 = vector.shape_cast %18 : vector<1x1x256xf32> to vector<1x256xf32>
    %20 = vector.broadcast %19 : vector<1x256xf32> to vector<4x256xf32>
    %21 = arith.mulf %17, %20 : vector<4x256xf32>
    %22 = arith.truncf %21 : vector<4x256xf32> to vector<4x256xbf16>
    %c0_10 = arith.constant 0 : index
    %c0_11 = arith.constant 0 : index
    %23 = vector.load %arg8[%c0_10, %c0_11] : memref<36x256xbf16, #tpu.memory_space<vmem>>, vector<4x256xbf16>
    tpu.vector_store %arg8[%c0_10, %c0_11], %22 {strides = array<i32>} : memref<36x256xbf16, #tpu.memory_space<vmem>>, vector<4x256xbf16>,
    %c16_i32 = arith.constant 16 : i32
    %24 = tpu.dynamic_rotate %16 by %c16_i32 dim 1 : vector<4x256xf32>, i32 -> vector<4x256xf32>
    %25 = vector.extract_strided_slice %2 {offsets = [1, 0, 0], sizes = [1, 1, 256], strides = [1, 1, 1]} : vector<9x1x256xf32> to vector<1x1x256xf32>
    %26 = vector.shape_cast %25 : vector<1x1x256xf32> to vector<1x256xf32>
    %27 = vector.broadcast %26 : vector<1x256xf32> to vector<4x256xf32>
    %28 = arith.mulf %24, %27 : vector<4x256xf32>
    %29 = arith.truncf %28 : vector<4x256xf32> to vector<4x256xbf16>
    %c4 = arith.constant 4 : index
    %c0_12 = arith.constant 0 : index
    %30 = vector.load %arg8[%c4, %c0_12] : memref<36x256xbf16, #tpu.memory_space<vmem>>, vector<4x256xbf16>
    tpu.vector_store %arg8[%c4, %c0_12], %29 {strides = array<i32>} : memref<36x256xbf16, #tpu.memory_space<vmem>>, vector<4x256xbf16>,
    %c15_i32 = arith.constant 15 : i32
    %31 = tpu.dynamic_rotate %16 by %c15_i32 dim 1 : vector<4x256xf32>, i32 -> vector<4x256xf32>
    %32 = vector.extract_strided_slice %2 {offsets = [2, 0, 0], sizes = [1, 1, 256], strides = [1, 1, 1]} : vector<9x1x256xf32> to vector<1x1x256xf32>
    %33 = vector.shape_cast %32 : vector<1x1x256xf32> to vector<1x256xf32>
    %34 = vector.broadcast %33 : vector<1x256xf32> to vector<4x256xf32>
    %35 = arith.mulf %31, %34 : vector<4x256xf32>
    %36 = arith.truncf %35 : vector<4x256xf32> to vector<4x256xbf16>
    %c8 = arith.constant 8 : index
    %c0_13 = arith.constant 0 : index
    %37 = vector.load %arg8[%c8, %c0_13] : memref<36x256xbf16, #tpu.memory_space<vmem>>, vector<4x256xbf16>
    tpu.vector_store %arg8[%c8, %c0_13], %36 {strides = array<i32>} : memref<36x256xbf16, #tpu.memory_space<vmem>>, vector<4x256xbf16>,
    %c1_i32 = arith.constant 1 : i32
    %38 = tpu.dynamic_rotate %16 by %c1_i32 dim 1 : vector<4x256xf32>, i32 -> vector<4x256xf32>
    %39 = vector.extract_strided_slice %2 {offsets = [3, 0, 0], sizes = [1, 1, 256], strides = [1, 1, 1]} : vector<9x1x256xf32> to vector<1x1x256xf32>
    %40 = vector.shape_cast %39 : vector<1x1x256xf32> to vector<1x256xf32>
    %41 = vector.broadcast %40 : vector<1x256xf32> to vector<4x256xf32>
    %42 = arith.mulf %38, %41 : vector<4x256xf32>
    %43 = arith.truncf %42 : vector<4x256xf32> to vector<4x256xbf16>
    %c12 = arith.constant 12 : index
    %c0_14 = arith.constant 0 : index
    %44 = vector.load %arg8[%c12, %c0_14] : memref<36x256xbf16, #tpu.memory_space<vmem>>, vector<4x256xbf16>
    tpu.vector_store %arg8[%c12, %c0_14], %43 {strides = array<i32>} : memref<36x256xbf16, #tpu.memory_space<vmem>>, vector<4x256xbf16>,
    %45 = arith.truncf %16 : vector<4x256xf32> to vector<4x256xbf16>
    %c16 = arith.constant 16 : index
    %c0_15 = arith.constant 0 : index
    %46 = vector.load %arg8[%c16, %c0_15] : memref<36x256xbf16, #tpu.memory_space<vmem>>, vector<4x256xbf16>
    tpu.vector_store %arg8[%c16, %c0_15], %45 {strides = array<i32>} : memref<36x256xbf16, #tpu.memory_space<vmem>>, vector<4x256xbf16>,
    %c255_i32 = arith.constant 255 : i32
    %47 = tpu.dynamic_rotate %16 by %c255_i32 dim 1 : vector<4x256xf32>, i32 -> vector<4x256xf32>
    %48 = vector.extract_strided_slice %2 {offsets = [5, 0, 0], sizes = [1, 1, 256], strides = [1, 1, 1]} : vector<9x1x256xf32> to vector<1x1x256xf32>
    %49 = vector.shape_cast %48 : vector<1x1x256xf32> to vector<1x256xf32>
    %50 = vector.broadcast %49 : vector<1x256xf32> to vector<4x256xf32>
    %51 = arith.mulf %47, %50 : vector<4x256xf32>
    %52 = arith.truncf %51 : vector<4x256xf32> to vector<4x256xbf16>
    %c20 = arith.constant 20 : index
    %c0_16 = arith.constant 0 : index
    %53 = vector.load %arg8[%c20, %c0_16] : memref<36x256xbf16, #tpu.memory_space<vmem>>, vector<4x256xbf16>
    tpu.vector_store %arg8[%c20, %c0_16], %52 {strides = array<i32>} : memref<36x256xbf16, #tpu.memory_space<vmem>>, vector<4x256xbf16>,
    %c241_i32 = arith.constant 241 : i32
    %54 = tpu.dynamic_rotate %16 by %c241_i32 dim 1 : vector<4x256xf32>, i32 -> vector<4x256xf32>
    %55 = vector.extract_strided_slice %2 {offsets = [6, 0, 0], sizes = [1, 1, 256], strides = [1, 1, 1]} : vector<9x1x256xf32> to vector<1x1x256xf32>
    %56 = vector.shape_cast %55 : vector<1x1x256xf32> to vector<1x256xf32>
    %57 = vector.broadcast %56 : vector<1x256xf32> to vector<4x256xf32>
    %58 = arith.mulf %54, %57 : vector<4x256xf32>
    %59 = arith.truncf %58 : vector<4x256xf32> to vector<4x256xbf16>
    %c24 = arith.constant 24 : index
    %c0_17 = arith.constant 0 : index
    %60 = vector.load %arg8[%c24, %c0_17] : memref<36x256xbf16, #tpu.memory_space<vmem>>, vector<4x256xbf16>
    tpu.vector_store %arg8[%c24, %c0_17], %59 {strides = array<i32>} : memref<36x256xbf16, #tpu.memory_space<vmem>>, vector<4x256xbf16>,
    %c240_i32 = arith.constant 240 : i32
    %61 = tpu.dynamic_rotate %16 by %c240_i32 dim 1 : vector<4x256xf32>, i32 -> vector<4x256xf32>
    %62 = vector.extract_strided_slice %2 {offsets = [7, 0, 0], sizes = [1, 1, 256], strides = [1, 1, 1]} : vector<9x1x256xf32> to vector<1x1x256xf32>
    %63 = vector.shape_cast %62 : vector<1x1x256xf32> to vector<1x256xf32>
    %64 = vector.broadcast %63 : vector<1x256xf32> to vector<4x256xf32>
    %65 = arith.mulf %61, %64 : vector<4x256xf32>
    %66 = arith.truncf %65 : vector<4x256xf32> to vector<4x256xbf16>
    %c28 = arith.constant 28 : index
    %c0_18 = arith.constant 0 : index
    %67 = vector.load %arg8[%c28, %c0_18] : memref<36x256xbf16, #tpu.memory_space<vmem>>, vector<4x256xbf16>
    tpu.vector_store %arg8[%c28, %c0_18], %66 {strides = array<i32>} : memref<36x256xbf16, #tpu.memory_space<vmem>>, vector<4x256xbf16>,
    %c239_i32 = arith.constant 239 : i32
    %68 = tpu.dynamic_rotate %16 by %c239_i32 dim 1 : vector<4x256xf32>, i32 -> vector<4x256xf32>
    %69 = vector.extract_strided_slice %2 {offsets = [8, 0, 0], sizes = [1, 1, 256], strides = [1, 1, 1]} : vector<9x1x256xf32> to vector<1x1x256xf32>
    %70 = vector.shape_cast %69 : vector<1x1x256xf32> to vector<1x256xf32>
    %71 = vector.broadcast %70 : vector<1x256xf32> to vector<4x256xf32>
    %72 = arith.mulf %68, %71 : vector<4x256xf32>
    %73 = arith.truncf %72 : vector<4x256xf32> to vector<4x256xbf16>
    %c32 = arith.constant 32 : index
    %c0_19 = arith.constant 0 : index
    %74 = vector.load %arg8[%c32, %c0_19] : memref<36x256xbf16, #tpu.memory_space<vmem>>, vector<4x256xbf16>
    tpu.vector_store %arg8[%c32, %c0_19], %73 {strides = array<i32>} : memref<36x256xbf16, #tpu.memory_space<vmem>>, vector<4x256xbf16>,
    %c0_20 = arith.constant 0 : index
    %c0_21 = arith.constant 0 : index
    %75 = vector.load %arg4[%c0_20, %c0_21] : memref<2x36xbf16, #tpu.memory_space<vmem>>, vector<2x36xbf16>
    %c0_22 = arith.constant 0 : index
    %c0_23 = arith.constant 0 : index
    %76 = vector.load %arg8[%c0_22, %c0_23] : memref<36x256xbf16, #tpu.memory_space<vmem>>, vector<36x256xbf16>
    %cst_24 = arith.constant dense<0.000000e+00> : vector<2x256xf32>
    %77 = tpu.matmul %75, %76, %cst_24 {dimension_numbers = #tpu.dot_dimension_numbers<[1], [0], [0], [1], [0, 0, 1, 1], [], []>} : vector<2x36xbf16>, vector<36x256xbf16>, vector<2x256xf32> -> vector<2x256xf32>
    %c0_25 = arith.constant 0 : index
    %c0_26 = arith.constant 0 : index
    %78 = vector.load %arg5[%c0_25, %c0_26] : memref<2x1xf32, #tpu.memory_space<vmem>>, vector<2x1xf32>
    %79 = vector.broadcast %78 : vector<2x1xf32> to vector<2x256xf32>
    %80 = arith.addf %77, %79 : vector<2x256xf32>
    %c0_27 = arith.constant 0 : index
    %c0_28 = arith.constant 0 : index
    %c0_29 = arith.constant 0 : index
    %81 = vector.load %arg6[%c0_27, %c0_28, %c0_29] : memref<1x2x256xf32, #tpu.memory_space<vmem>>, vector<1x2x256xf32>
    %82 = vector.shape_cast %81 : vector<1x2x256xf32> to vector<2x256xf32>
    %83 = vector.shape_cast %80 : vector<2x256xf32> to vector<1x2x256xf32>
    tpu.vector_store %arg6[%c0_27, %c0_28, %c0_29], %83 {strides = array<i32>} : memref<1x2x256xf32, #tpu.memory_space<vmem>>, vector<1x2x256xf32>,
    %cst_30 = arith.constant dense<0.000000e+00> : vector<2xf32>
    %84 = vector.multi_reduction <add>, %80, %cst_30 [1] : vector<2x256xf32> to vector<2xf32>
    %85 = vector.shape_cast %84 : vector<2xf32> to vector<2x1xf32>
    %86 = arith.mulf %80, %80 : vector<2x256xf32>
    %cst_31 = arith.constant dense<0.000000e+00> : vector<2xf32>
    %87 = vector.multi_reduction <add>, %86, %cst_31 [1] : vector<2x256xf32> to vector<2xf32>
    %88 = vector.shape_cast %87 : vector<2xf32> to vector<2x1xf32>
    %89 = tpu.concatenate %85, %88 in 1 : vector<2x1xf32>, vector<2x1xf32> -> vector<2x2xf32>
    %c0_32 = arith.constant 0 : index
    %c0_33 = arith.constant 0 : index
    %c0_34 = arith.constant 0 : index
    %90 = vector.load %arg7[%c0_32, %c0_33, %c0_34] : memref<1x2x2xf32, #tpu.memory_space<vmem>>, vector<1x2x2xf32>
    %91 = vector.shape_cast %90 : vector<1x2x2xf32> to vector<2x2xf32>
    %92 = vector.shape_cast %89 : vector<2x2xf32> to vector<1x2x2xf32>
    tpu.vector_store %arg7[%c0_32, %c0_33, %c0_34], %92 {strides = array<i32>} : memref<1x2x2xf32, #tpu.memory_space<vmem>>, vector<1x2x2xf32>,
    return
  }
  func.func @transform_0(%arg0: i32) -> (i32, i32, i32) {
    %c0_i32 = arith.constant 0 : i32
    %c0_i32_0 = arith.constant 0 : i32
    %c0_i32_1 = arith.constant 0 : i32
    return %arg0, %c0_i32, %c0_i32_0 : i32, i32, i32
  }
  func.func @transform_1(%arg0: i32) -> (i32, i32) {
    %c0_i32 = arith.constant 0 : i32
    %c0_i32_0 = arith.constant 0 : i32
    %c0_i32_1 = arith.constant 0 : i32
    return %c0_i32, %c0_i32_0 : i32, i32
  }
  func.func @transform_2(%arg0: i32) -> (i32, i32, i32) {
    %c0_i32 = arith.constant 0 : i32
    %c0_i32_0 = arith.constant 0 : i32
    %c0_i32_1 = arith.constant 0 : i32
    %c0_i32_2 = arith.constant 0 : i32
    return %c0_i32, %c0_i32_0, %c0_i32_1 : i32, i32, i32
  }
  func.func @transform_3(%arg0: i32) -> (i32, i32) {
    %c0_i32 = arith.constant 0 : i32
    %c0_i32_0 = arith.constant 0 : i32
    %c0_i32_1 = arith.constant 0 : i32
    return %c0_i32, %c0_i32_0 : i32, i32
  }
  func.func @transform_4(%arg0: i32) -> (i32, i32) {
    %c0_i32 = arith.constant 0 : i32
    %c0_i32_0 = arith.constant 0 : i32
    %c0_i32_1 = arith.constant 0 : i32
    return %c0_i32, %c0_i32_0 : i32, i32
  }
  func.func @transform_5(%arg0: i32) -> (i32, i32, i32) {
    %c0_i32 = arith.constant 0 : i32
    %c0_i32_0 = arith.constant 0 : i32
    %c0_i32_1 = arith.constant 0 : i32
    return %arg0, %c0_i32, %c0_i32_0 : i32, i32, i32
  }
  func.func @transform_6(%arg0: i32) -> (i32, i32, i32) {
    %c0_i32 = arith.constant 0 : i32
    %c0_i32_0 = arith.constant 0 : i32
    %c0_i32_1 = arith.constant 0 : i32
    return %arg0, %c0_i32, %c0_i32_0 : i32, i32, i32
  }
}

</mosaic_0001>

<bundles_post_ra>
// kernel: tpu_custom_call.1
= control target key start
LH: loop header
LB: loop body
LE: loop exit
PB: predicated region body
PF: predicated region fallthrough
CT: control target
= control target key end

     0   :  { %12 = vsyncpa [#allocation4], 0  ;;  %s1467_s0 = inlined_call_operand.hbm [shape: f32[2,4,256], index: 0, kind: input, shape index: {}]   ;;  %s1468_s1 = inlined_call_operand.vmem [shape: f32[4,2], index: 1, kind: input, shape index: {}]   ;;  %s1469_s2 = inlined_call_operand.hbm [shape: f32[9,1,256], index: 2, kind: input, shape index: {}]   ;;  %s1470_s3 = inlined_call_operand.vmem [shape: bf16[2,36], index: 3, kind: input, shape index: {}]   ;;  %s1471_s4 = inlined_call_operand.vmem [shape: f32[2,1], index: 4, kind: input, shape index: {}]   ;;  %s1472_s5 = inlined_call_operand.hbm [shape: f32[2,2,256], index: 5, kind: output, shape index: {0}]   ;;  %s1473_s6 = inlined_call_operand.hbm [shape: f32[2,2,2], index: 6, kind: output, shape index: {1}]  }
   0x1   :  { %14 = vsyncpa [#allocation4 + $0x1], 0 }
   0x2   :  { %15 = vsyncpa [#allocation7], 0 }
   0x3   :  { %16 = vsyncpa [#allocation5], 0 }
   0x4   :  { %18 = vsyncpa [#allocation5 + $0x1], 0 }
   0x5   :  { %19 = vsyncpa [#allocation10], 0 }
   0x6   :  { %21 = vsyncpa [#allocation10 + $0x1], 0  ;;  %s1200_s21 = smov 0   ;;  %s1202_s22 = smov 0  }
   0x7   :  { %s1204_s23 = smov 0   ;;  %s1206_s24 = smov 0  }
   0x8 LB: > { %s1221_s25 = sadd.s32 4294967295, %s1146_s24   ;;  %s848_s26 = sadd.s32 4294967294, %s1146_s24   ;;  %s1146_s24 = sphi %s1206_s24, %s1493_s24   ;;  %s1142_s23 = sphi %s1204_s23, %s1492_s23   ;;  %s1138_s22 = sphi %s1202_s22, %s1491_s22   ;;  %s1134_s21 = sphi %s1200_s21, %s1490_s21  }
   0x9   : > { %p47_p0 = scmp.ne.s32.totalorder %s1138_s22, %s1134_s21  ;;  %p1474_p1 = scmp.eq.s32.totalorder %s1221_s25, 0 }
   0xa   : > { %p161_p3 = scmp.eq.s32.totalorder %s848_s26, 1  ;;  %p849_p5 = scmp.ge.s32.totalorder %s1146_s24, 1 }
   0xb   : > { %p1230_p4 = por %p1474_p1, %p47_p0  ;;  %p194_p7 = scmp.lt.s32.totalorder %s1146_s24, 3 }
   0xc   : > { %p1235_p6 = por %p161_p3, %p47_p0  ;;  %s1148_s30 = smov [#allocation6]  }
   0xd   : > { %s1477_s27 = scalar_select %p1230_p4, 1, 0 }
   0xe   : > { %s1478_s28 = scalar_select %p1235_p6, 1, 0 }
   0xf   : > { %p1240_p8 = pnand %p849_p5, %p194_p7  ;;  %s209_s7 = sshll.u32 %s1148_s30, 4  ;;  %s1244_s7 = int_to_ptr.vmem [resolvable:$true] %s209_s7 }
  0x10   : > { %s1256_s9 = sadd.s32 1, %s1146_s24   ;;  %s34_s10 = sadd.s32 1, %s1142_s23 }
  0x11   : > { %s1479_s29 = scalar_select %p1240_p8, 1, 0 }
  0x12   : > { %p907_p9 = pneg %p1240_p8  ;;  %s31_s11 = ssub.s32 %s1146_s24, %s1256_s9 }
  0x13   : > { %s986_s14 = scalar_lea.hbm %s1469_s2, 288 }
  0x14   : > { %p1251_p11 = pnand %p907_p9, %p1474_p1  ;;  %p987_p12 = scmp.ne.s32.totalorder %s1469_s2, %s986_s14 }
  0x15   : > { %p993_p5 = scmp.lt.u32.totalorder %s986_s14, %s1469_s2 }
  0x16   : > { %p988_p13 = pneg %p1251_p11 }
  0x18   : > { %p989_p0 = pnand %p988_p13, %p987_p12 }
  0x1a   : > { %p990_p3 = pneg %p989_p0 }
  0x1c   : > { %p995_p7 = pnand %p993_p5, %p990_p3 }
  0x1e   : > { %998 = shalt.err (!%p995_p7)
}
  0x1f   : > { %s999_s19 = scalar_lea.vmem %s1244_s7, 288  ;;  %p1007_p2 = scmp.lt.s32.totalorder %s1244_s7, %s1244_s7 }
  0x20   : > { %p1000_p9 = scmp.ne.s32.totalorder %s1244_s7, %s999_s19  ;;  %p1008_p6 = scmp.lt.s32.totalorder %s999_s19, %s999_s19 }
  0x22   : > { %p1002_p10 = pnand %p1000_p9, %p988_p13  ;;  %p1009_p4 = por %p1008_p6, %p1007_p2 }
  0x24   : > { %p1003_p1 = pneg %p1002_p10 }
  0x26   : > { %p1010_p8 = pnand %p1009_p4, %p1003_p1 }
  0x28   : > { %1013 = shalt.err (!%p1010_p8)
}
  0x29   : > { %s1149_s20 = smov 32   ;;  %s1150_s26 = smov 2  }
  0x2a   : > { %910 = dma.hbm_to_vmem [thread:$0]  (!%p1251_p11), %s1469_s2, 288, %s1244_s7, [#allocation7], %s1149_s20, %s1149_s20, %s1150_s26  }
  0x2b   : > { %p32_p2 = scmp.eq.s32.totalorder %s31_s11, 0  ;;  %p41_p1 = scmp.ne.s32.totalorder %s1142_s23, %s1138_s22 }
  0x2c   : > { %p42_p4 = scmp.eq.s32.totalorder %s1146_s24, 0  ;;  %p923_p6 = scmp.lt.s32.totalorder %s1146_s24, 2 }
  0x2d   : > { %s1287_s13 = scalar_select %p32_p2, %s1142_s23, %s34_s10  }
  0x2e   : > { %p43_p8 = por %p42_p4, %p41_p1  ;;  %p1481_p10 = scmp.eq.s32.totalorder %s1221_s25, 1 }
  0x2f   : > { %s229_s15 = sand.u32 1, %s1142_s23   ;;  %s886_s16 = sshll.u32 %s1146_s24, 7 }
  0x30   : > { %p1291_p12 = por %p1481_p10, %p41_p1  ;;  %s852_s17 = sshll.u32 %s229_s15, 3 }
  0x31   : > { %s1300_s19 = scalar_lea.hbm %s1467_s0, %s886_s16  ;;  %s233_s7 = scalar_lea.vmem [#allocation3], %s852_s17 }
  0x32   : > { %s241_s10 = sshll.u32 %s233_s7, 4  ;;  %p1302_p11 = pnand %p923_p6, %p43_p8  ;;  %s1306_s10 = int_to_ptr.vmem [resolvable:$true] %s241_s10 }
  0x33   : > { %s230_s20 = scalar_lea.sflag [#allocation4], %s229_s15  ;;  %s1014_s26 = scalar_lea.hbm %s1300_s19, 128 }
  0x34   : > { %p1015_p13 = scmp.ne.s32.totalorder %s1300_s19, %s1014_s26  ;;  %p1016_p0 = pneg %p1302_p11 }
  0x35   : > { %s1019_s16 = scalar_lea.hbm %s1467_s0, 256  ;;  %p1020_p7 = scmp.lt.u32.totalorder %s1300_s19, %s1467_s0 }
  0x36   : > { %p1017_p3 = pnand %p1016_p0, %p1015_p13  ;;  %p1021_p9 = scmp.lt.u32.totalorder %s1019_s16, %s1014_s26 }
  0x37   : > { %p1023_p1 = scmp.lt.u32.totalorder %s1014_s26, %s1300_s19 }
  0x38   : > { %p1018_p5 = pneg %p1017_p3  ;;  %p1022_p2 = por %p1021_p9, %p1020_p7 }
  0x3a   : > { %p1024_p4 = por %p1023_p1, %p1022_p2 }
  0x3c   : > { %p1025_p6 = pnand %p1024_p4, %p1018_p5 }
  0x3e   : > { %1028 = shalt.err (!%p1025_p6)
}
  0x3f   : > { %s1029_s15 = scalar_lea.vmem %s1306_s10, 128  ;;  %s1151_s18 = smov [#allocation3]  }
  0x40   : > { %p1030_p8 = scmp.ne.s32.totalorder %s1306_s10, %s1029_s15  ;;  %s1034_s7 = sshll.u32 %s1151_s18, 4  ;;  %s1035_s7 = int_to_ptr.vmem [resolvable:$false] %s1034_s7 }
  0x41   : > { %s1036_s30 = scalar_lea.vmem %s1035_s7, 256  ;;  %p1037_p3 = scmp.lt.s32.totalorder %s1306_s10, %s1035_s7 }
  0x42   : > { %p1032_p10 = pnand %p1030_p8, %p1016_p0  ;;  %p1038_p7 = scmp.lt.s32.totalorder %s1036_s30, %s1029_s15 }
  0x44   : > { %p1033_p13 = pneg %p1032_p10  ;;  %p1039_p9 = por %p1038_p7, %p1037_p3 }
  0x46   : > { %p1040_p2 = pnand %p1039_p9, %p1033_p13 }
  0x48   : > { %1043 = shalt.err (!%p1040_p2)
}
  0x49   : > { %914 = dma.hbm_to_vmem [thread:$0]  (!%p1302_p11), %s1300_s19, 128, %s1306_s10, %s230_s20  }
  0x4a   : > { %p1484_p5 = scmp.ne.s32.totalorder %s1479_s29, 0 }
  0x4b   : > { %s1336_s26 = sand.u32 (!%p1484_p5), 1, %s1138_s22   ;;  %p1485_p0 = scmp.ne.s32.totalorder (!%p1484_p5), %s1477_s27, 0 }
  0x4c   : > { %250 = sbr.rel (%p1484_p5) target bundleno = 787 (0x313), region = 40  ;;  %s856_s12 = sshll.u32 (!%p1484_p5), %s1336_s26, 3 }
  0x4d   : > { %s253_s16 = scalar_lea.sflag (!%p1484_p5), [#allocation4], %s1336_s26  ;;  %s256_s17 = scalar_lea.vmem (!%p1484_p5), [#allocation3], %s856_s12 }
  0x53   : > { %1117 = dma.done.wait (%p1485_p0), %s253_s16, 128  }
  0x54   : > { %1119 = vsyncadd (%p1485_p0), %s253_s16, 4294967168  ;;  %p1486_p1 = scmp.eq.s32.totalorder %s1221_s25, 0 }
  0x56   : > { %1121 = dma.done.wait (%p1486_p1), [#allocation7], 288   ;;  %p1487_p11 = pmov %p1486_p1 }
  0x57   : > { %v1152_v0 = vmov 0   ;;  %v295_v1 = vld [vmem:[%s1468_s1] sm:$0xf]  ;;  %v1153_v2 = vmov 1   ;;  %v1154_v3 = vmov 839922192   ;;  %v312_v5 = vlaneseq }
  0x58   : > { %1123 = vsyncadd (%p1487_p11), [#allocation7], 4294967008  ;;  %972 = vset.pattern.permute.xlu0 %v1152_v0  ;;  %666 = vmatprep.mubr.bf16.mxu0 %v1152_v0  ;;  %v310_v4 = vunpack.c.l.s4 %v1154_v3  ;;  %v304_v11 = vld [vmem:[%s256_s17] sm:$0xff]  ;;  %s1155_s27 = smov 16   ;;  %s1156_s10 = smov 1   ;;  %vm627_vm9 = vcmask 1041408  }
  0x59   : > { %974 = vset.pattern.permute.xlu1 %v1152_v0  ;;  %307 = vperm.xlu0 %972, %v295_v1   ;;  %v313_v7 = vshrl.u32 %v312_v5, 7  ;;  %s1157_s11 = smov 17   ;;  %s1158_s20 = smov 15   ;;  %v592_v23 = vld [vmem:[%s1471_s4] sm:$0x3]  ;;  %v1354_v24 = vand.u32 127, %v312_v5 }
  0x5a   : > { %v311_v6 = vunpack.c.0.s8 %v310_v4  ;;  %s1159_s8 = smov 127   ;;  %s1160_s15 = smov 112   ;;  %v299_v27 = vld [vmem:[#allocation6 + $0x6] sm:$0x3]  ;;  %v296_v32 = vld [vmem:[#allocation6] sm:$0x3] }
  0x5b   : > { %s1161_s18 = smov 113   ;;  %s1162_s7 = smov 111   ;;  %v1356_v25 = vsub.s32 0, %v313_v7  ;;  %v1358_v26 = vsub.s32 1, %v313_v7  ;;  %vm433_vm1 = vcmp.lt.s32.totalorder %v1354_v24, 1  ;;  %vm345_vm2 = vcmp.lt.s32.totalorder %v1354_v24, 17 }
  0x5c   : > { %v314_v8 = vsub.s32 %v311_v6, %v313_v7  ;;  %v298_v41 = vld [vmem:[#allocation6 + $0x4] sm:$0x3]  ;;  %vm404_vm3 = vcmp.lt.s32.totalorder %v1354_v24, 15  ;;  %v300_v52 = vld [vmem:[#allocation6 + $0xa] sm:$0x3]  ;;  %vm472_vm4 = vcmp.lt.s32.totalorder %v1354_v24, 127 }
  0x5d   : > { %973 = vset.pattern.permute.xlu0 %v1153_v2  ;;  %v440_v30 = vrot.slane %v299_v27, %v1356_v25  ;;  %v444_v31 = vrot.slane %v299_v27, %v1358_v26  ;;  %v352_v39 = vrot.slane %v296_v32, %v1356_v25  ;;  %v356_v40 = vrot.slane %v296_v32, %v1358_v26  ;;  %v297_v62 = vld [vmem:[#allocation6 + $0x2] sm:$0x3]  ;;  %v302_v7 = vld [vmem:[#allocation6 + $0xe] sm:$0x3]  ;;  %v303_v32 = vld [vmem:[#allocation6 + $0x10] sm:$0x3] }
  0x5e   : > { %319 = vperm.xlu0 %973, %v295_v1   ;;  %v411_v46 = vrot.slane %v298_v41, %v1356_v25  ;;  %v415_v51 = vrot.slane %v298_v41, %v1358_v26  ;;  %v479_v60 = vrot.slane %v300_v52, %v1356_v25  ;;  %v483_v61 = vrot.slane %v300_v52, %v1358_v26  ;;  %s858_s29 = sshll.u32 %s1336_s26, 2 }
  0x5f   : > { %vm374_vm5 = vcmp.lt.s32.totalorder %v1354_v24, 16  ;;  %v381_v5 = vrot.slane %v297_v62, %v1356_v25  ;;  %v385_v6 = vrot.slane %v297_v62, %v1358_v26  ;;  %vm531_vm6 = vcmp.lt.s32.totalorder %v1354_v24, 112  ;;  %s286_s19 = scalar_lea.vmem [#allocation8], %s858_s29 }
  0x60   : > { %vm502_vm7 = vcmp.lt.s32.totalorder %v1354_v24, 113  ;;  %vm561_vm8 = vcmp.lt.s32.totalorder %v1354_v24, 111  ;;  %v572_v41 = vrot.slane %v303_v32, %v1358_v26  ;;  %vm623_vm10 = vcmask 293888  }
  0x62   : > { %975 = vset.pattern.permute.xlu0 %v1152_v0 }
  0xd8   : > { %v308_v9 = vpop.permute.xlu0 %307 }
  0xd9   : > { %v315_v10 = vrot.slane %v308_v9, %v314_v8 }
  0xdb   : > { %v317_v13 = vmul.f32 %v315_v10, %v304_v11 }
  0xdd   : > { %v320_v12 = vpop.permute.xlu0 %319 }
  0xde   : > { %v327_v14 = vrot.slane %v320_v12, %v314_v8 }
  0xe0   : > { %v329_v15 = vadd.f32 %v327_v14, %v317_v13  ;;  %v538_v13 = vrot.slane %v302_v7, %v1356_v25 }
  0xe2   : > { %v331_v16 = vmin.f32 %v329_v15, 0.0  ;;  %vm330_vm0 = vcmp.gt.f32.partialorder %v329_v15, 0.0 }
  0xe4   : > { %v332_v17 = vmul.f32 1.442695, %v331_v16 }
  0xe6   : > { %984 = vpow2.f32 %v332_v17  ;;  %v542_v17 = vrot.slane %v302_v7, %v1358_v26 }
  0xf0   : > { %v985_v18 = vpop.eup %984 }
  0xf1   : > { %v860_v19 = vadd.f32 -1.0, %v985_v18  ;;  %v301_v18 = vld [vmem:[#allocation6 + $0xc] sm:$0x3] }
  0xf3   : > { %v335_v20 = vsel %vm330_vm0, %v329_v15, %v860_v19 }
  0xf4   : > { %v337_v21 = vcombine.high %v335_v20, %v335_v20  ;;  %370 = vrot.lane.b32.xlu1 %v335_v20, %s1155_s27 }
  0xf6   : > { %v891_v22 = vpack.c.bf16 %v337_v21, %v335_v20  ;;  %431 = vrot.lane.b32.xlu0 %v337_v21, %s1156_s10 }
  0xf8   : > { %467 = vst [vmem:[#allocation2 + $0x10] sm:$0x33] %v891_v22  ;;  %429 = vrot.lane.b32.xlu1 %v335_v20, %s1156_s10 }
  0xfa   : > { %341 = vrot.lane.b32.xlu0 %v337_v21, %s1157_s11 }
  0xfc   : > { %339 = vrot.lane.b32.xlu1 %v335_v20, %s1157_s11 }
  0xfe   : > { %402 = vrot.lane.b32.xlu0 %v337_v21, %s1158_s20 }
 0x100   : > { %400 = vrot.lane.b32.xlu1 %v335_v20, %s1158_s20 }
 0x102   : > { %470 = vrot.lane.b32.xlu0 %v337_v21, %s1159_s8 }
 0x104   : > { %468 = vrot.lane.b32.xlu1 %v335_v20, %s1159_s8  ;;  %s723_s8 = sshll.u32 %s286_s19, 4  ;;  %s724_s8 = int_to_ptr.vmem [resolvable:$true] %s723_s8 }
 0x106   : > { %529 = vrot.lane.b32.xlu0 %v337_v21, %s1160_s15 }
 0x108   : > { %372 = vrot.lane.b32.xlu1 %v337_v21, %s1155_s27  ;;  %s896_s27 = sshll.u32 %s1221_s25, 6 }
 0x109   : > { %s1398_s20 = scalar_lea.hbm %s1472_s5, %s896_s27 }
 0x10a   : > { %500 = vrot.lane.b32.xlu0 %v337_v21, %s1161_s18 }
 0x10c   : > { %527 = vrot.lane.b32.xlu1 %v335_v20, %s1160_s15  ;;  %s704_s15 = scalar_lea.sflag [#allocation5], %s1336_s26 }
 0x10e   : > { %559 = vrot.lane.b32.xlu0 %v337_v21, %s1162_s7 }
 0x110   : > { %498 = vrot.lane.b32.xlu1 %v335_v20, %s1161_s18  ;;  %s1044_s18 = scalar_lea.vmem %s724_s8, 64 }
 0x111   : > { %p1045_p4 = scmp.ne.s32.totalorder %s724_s8, %s1044_s18 }
 0x113   : > { %p1046_p6 = pnand %p1045_p4, %p1291_p12 }
 0x114   : > { %557 = vrot.lane.b32.xlu1 %v335_v20, %s1162_s7  ;;  %s1163_s7 = smov [#allocation8]  }
 0x115   : > { %p1047_p8 = pneg %p1046_p6  ;;  %s1048_s30 = sshll.u32 %s1163_s7, 4  ;;  %s1049_s30 = int_to_ptr.vmem [resolvable:$false] %s1048_s30 }
 0x116   : > { %s1050_s12 = scalar_lea.vmem %s1049_s30, 128  ;;  %p1051_p10 = scmp.lt.s32.totalorder %s724_s8, %s1049_s30 }
 0x117   : > { %p1052_p13 = scmp.lt.s32.totalorder %s1050_s12, %s1044_s18 }
 0x118   : > { %595 = vperm.xlu1 %974, %v592_v23   ;;  %v509_v23 = vrot.slane %v301_v18, %v1356_v25 }
 0x119   : > { %p1053_p3 = por %p1052_p13, %p1051_p10 }
 0x11b   : > { %p1054_p7 = pnand %p1053_p3, %p1047_p8 }
 0x166   : > { %v371_v28 = vpop.permute.xlu1 %370 }
 0x168   : > { %v432_v29 = vpop.permute.xlu0 %431 }
 0x16a   : > { %v430_v33 = vpop.permute.xlu1 %429 }
 0x16b   : > { %v434_v34 = vsel %vm433_vm1, %v430_v33, %v432_v29  ;;  %v435_v35 = vsel %vm433_vm1, %v432_v29, %v430_v33 }
 0x16c   : > { %v447_v36 = vmul.f32 %v440_v30, %v435_v35  ;;  %v448_v37 = vmul.f32 %v444_v31, %v434_v34  ;;  %v342_v38 = vpop.permute.xlu0 %341  ;;  %v513_v31 = vrot.slane %v301_v18, %v1358_v26 }
 0x16e   : > { %v890_v42 = vpack.c.bf16 %v448_v37, %v447_v36  ;;  %v340_v43 = vpop.permute.xlu1 %339  ;;  %v568_v37 = vrot.slane %v303_v32, %v1356_v25 }
 0x16f   : > { %v346_v44 = vsel %vm345_vm2, %v340_v43, %v342_v38  ;;  %v347_v45 = vsel %vm345_vm2, %v342_v38, %v340_v43 }
 0x170   : > { %v456_v47 = vrot.slane %v890_v42, 6  ;;  %v359_v48 = vmul.f32 %v352_v39, %v347_v45  ;;  %v360_v49 = vmul.f32 %v356_v40, %v346_v44  ;;  %v403_v50 = vpop.permute.xlu0 %402 }
 0x172   : > { %458 = vst [vmem:[#allocation2 + $0x8] sm:$0xcc] %v456_v47  ;;  %v887_v53 = vpack.c.bf16 %v360_v49, %v359_v48  ;;  %v401_v54 = vpop.permute.xlu1 %400 }
 0x173   : > { %v405_v55 = vsel %vm404_vm3, %v401_v54, %v403_v50  ;;  %v406_v56 = vsel %vm404_vm3, %v403_v50, %v401_v54 }
 0x174   : > { %369 = vst [vmem:[#allocation2] sm:$0x33] %v887_v53  ;;  %v418_v57 = vmul.f32 %v411_v46, %v406_v56  ;;  %v419_v58 = vmul.f32 %v415_v51, %v405_v55  ;;  %v471_v59 = vpop.permute.xlu0 %470  ;;  %v586_v55 = vld [vmem:[%s1470_s3] sm:$0x1] }
 0x176   : > { %v889_v63 = vpack.c.bf16 %v419_v58, %v418_v57  ;;  %v469_v0 = vpop.permute.xlu1 %468 }
 0x177   : > { %v473_v1 = vsel %vm472_vm4, %v469_v0, %v471_v59  ;;  %v474_v2 = vsel %vm472_vm4, %v471_v59, %v469_v0 }
 0x178   : > { %428 = vst [vmem:[#allocation2 + $0x8] sm:$0x33] %v889_v63  ;;  %v486_v3 = vmul.f32 %v479_v60, %v473_v1  ;;  %v487_v4 = vmul.f32 %v483_v61, %v474_v2  ;;  %v530_v9 = vpop.permute.xlu0 %529 }
 0x17a   : > { %v892_v8 = vpack.c.bf16 %v487_v4, %v486_v3  ;;  %v373_v10 = vpop.permute.xlu1 %372 }
 0x17b   : > { %v375_v11 = vsel %vm374_vm5, %v371_v28, %v373_v10  ;;  %v376_v12 = vsel %vm374_vm5, %v373_v10, %v371_v28 }
 0x17c   : > { %v495_v14 = vrot.slane %v892_v8, 6  ;;  %v388_v15 = vmul.f32 %v381_v5, %v376_v12  ;;  %v389_v16 = vmul.f32 %v385_v6, %v375_v11  ;;  %v501_v28 = vpop.permute.xlu0 %500 }
 0x17e   : > { %497 = vst [vmem:[#allocation2 + $0x10] sm:$0xcc] %v495_v14  ;;  %v888_v19 = vpack.c.bf16 %v389_v16, %v388_v15  ;;  %v528_v20 = vpop.permute.xlu1 %527 }
 0x17f   : > { %v532_v21 = vsel %vm531_vm6, %v528_v20, %v530_v9  ;;  %v533_v22 = vsel %vm531_vm6, %v530_v9, %v528_v20 }
 0x180   : > { %v397_v27 = vrot.slane %v888_v19, 6  ;;  %v545_v29 = vmul.f32 %v538_v13, %v532_v21  ;;  %v546_v30 = vmul.f32 %v542_v17, %v533_v22  ;;  %v560_v42 = vpop.permute.xlu0 %559 }
 0x182   : > { %399 = vst [vmem:[#allocation2] sm:$0xcc] %v397_v27  ;;  %v894_v33 = vpack.c.bf16 %v546_v30, %v545_v29  ;;  %v499_v34 = vpop.permute.xlu1 %498 }
 0x183   : > { %v503_v35 = vsel %vm502_vm7, %v499_v34, %v501_v28  ;;  %v504_v36 = vsel %vm502_vm7, %v501_v28, %v499_v34 }
 0x184   : > { %v554_v38 = vrot.slane %v894_v33, 6  ;;  %v516_v39 = vmul.f32 %v509_v23, %v503_v35  ;;  %v517_v40 = vmul.f32 %v513_v31, %v504_v36 }
 0x186   : > { %556 = vst [vmem:[#allocation2 + $0x18] sm:$0xcc] %v554_v38  ;;  %v893_v43 = vpack.c.bf16 %v517_v40, %v516_v39  ;;  %v558_v44 = vpop.permute.xlu1 %557 }
 0x187   : > { %v562_v45 = vsel %vm561_vm8, %v558_v44, %v560_v42  ;;  %v563_v46 = vsel %vm561_vm8, %v560_v42, %v558_v44 }
 0x188   : > { %526 = vst [vmem:[#allocation2 + $0x18] sm:$0x33] %v893_v43  ;;  %v575_v47 = vmul.f32 %v568_v37, %v562_v45  ;;  %v576_v48 = vmul.f32 %v572_v41, %v563_v46 }
 0x189   : > { %v976_v49 = vld [vmem:[#allocation2 + $0x4] ss:$8 sps:$4 sm:$0xff]   ;;  %v978_v50 = vld [vmem:[#allocation2] ss:$8 sps:$4 sm:$0xff]  }
 0x18a   : > { %v895_v51 = vpack.c.bf16 %v576_v48, %v575_v47  ;;  %634 = vmatprep.subr.bf16.mxu0 %v976_v49 }
 0x18b   : > { %635 = vmatpush1.bf16.msra.mxu0 %v978_v50 }
 0x18c   : > { %585 = vst [vmem:[#allocation2 + $0x20] sm:$0x33] %v895_v51 }
 0x18f   : > { %v979_v24 = vld [vmem:[#allocation2 + $0x14] ss:$8 sps:$4 sm:$0xff]   ;;  %v981_v25 = vld [vmem:[#allocation2 + $0x10] ss:$8 sps:$4 sm:$0xff]  }
 0x190   : > { %636 = vmatprep.subr.bf16.mxu0 %v979_v24 }
 0x191   : > { %637 = vmatpush1.bf16.msra.mxu0 %v981_v25 }
 0x193   : > { %v591_v26 = vld [vmem:[#allocation2 + $0x20] sm:$0x33] }
 0x194   : > { %v875_v52 = vcombine.high %v591_v26, %v591_v26  ;;  %v874_v53 = vcombine.low %v591_v26, %v591_v26 }
 0x196   : > { %876 = vmatprep.subr.msk.bf16.mxu0 %vm627_vm9, %v875_v52  ;;  %v629_v54 = vsel %vm627_vm9, %v874_v53, 0 }
 0x197   : > { %639 = vmatpush1.bf16.msra.mxu0 %v629_v54  ;;  %v596_v56 = vpop.permute.xlu1 %595 }
 0x19a   : > { %877 = vmatmul.mubr.msk.bf16.vlgmr.msra.gmra.mrb[0].mxu0 %vm623_vm10, %v586_v55 }
 0x26d   : > { %v668_v57 = vpop.f32.mrb[0].mxu0 }
 0x26e   : > { %v669_v58 = vadd.f32 %v668_v57, %v596_v56  ;;  %v670_v59 = vpop.f32.mrb[1].mxu0 }
 0x26f   : > { %v671_v60 = vadd.f32 %v670_v59, %v596_v56  ;;  %v672_v61 = vpop.f32.mrb[2].mxu0 }
 0x270   : > { %v673_v62 = vpop.f32.mrb[3].mxu0  ;;  %v687_v63 = vsel %vm627_vm9, %v669_v58, 0.0  ;;  %v692_v0 = vmul.f32 %v669_v58, %v669_v58 }
 0x271   : > { %v677_v1 = vcombine.low %v669_v58, %v671_v60  ;;  %v688_v2 = vsel %vm627_vm9, %v671_v60, 0.0  ;;  %v693_v3 = vmul.f32 %v671_v60, %v671_v60 }
 0x272   : > { %v689_v4 = vadd.f32 %v688_v2, %v687_v63  ;;  %v694_v5 = vsel %vm627_vm9, %v692_v0, 0.0 }
 0x273   : > { %v695_v6 = vsel %vm627_vm9, %v693_v3, 0.0  ;;  %878 = vst.sshfl [vmem:[%s286_s19] sm:$0x33 pattern:$0x76325410] %v677_v1 }
 0x274   : > { %690 = vadd.xlane.f32.xlu0 %v689_v4  ;;  %v696_v7 = vadd.f32 %v695_v6, %v694_v5 }
 0x276   : > { %697 = vadd.xlane.f32.xlu1 %v696_v7 }
 0x277   : > { %1057 = shalt.err (!%p1054_p7)
}
 0x278   : > { %s1058_s16 = scalar_lea.hbm %s1398_s20, 64  ;;  %s1062_s19 = scalar_lea.hbm %s1472_s5, 128 }
 0x279   : > { %p1059_p9 = scmp.ne.s32.totalorder %s1398_s20, %s1058_s16  ;;  %p1063_p0 = scmp.lt.u32.totalorder %s1398_s20, %s1472_s5 }
 0x27a   : > { %p1064_p1 = scmp.lt.u32.totalorder %s1062_s19, %s1058_s16  ;;  %p1066_p4 = scmp.lt.u32.totalorder %s1058_s16, %s1398_s20 }
 0x27b   : > { %p1060_p2 = pnand %p1059_p9, %p1291_p12 }
 0x27c   : > { %p1065_p11 = por %p1064_p1, %p1063_p0 }
 0x27d   : > { %p1061_p5 = pneg %p1060_p2 }
 0x27e   : > { %p1067_p6 = por %p1066_p4, %p1065_p11 }
 0x280   : > { %p1068_p8 = pnand %p1067_p6, %p1061_p5 }
 0x282   : > { %1071 = shalt.err (!%p1068_p8)
}
 0x283   : > { %903 = dma.vmem_to_hbm [thread:$0]  (%p1291_p12), %s724_s8, 64, %s1398_s20, %s704_s15   ;;  %vm699_vm11 = vcmask 7168   ;;  %vm701_vm12 = vcmask 9216  }
 0x284   : > { %s859_s11 = sshll.u32 %s1336_s26, 1  ;;  %s883_s18 = sshll.u32 %s1221_s25, 5 }
 0x285   : > { %s293_s7 = scalar_lea.vmem [#allocation9], %s859_s11  ;;  %s1423_s17 = scalar_lea.hbm %s1473_s6, %s883_s18 }
 0x286   : > { %s736_s30 = sshll.u32 %s293_s7, 4  ;;  %s709_s20 = scalar_lea.sflag [#allocation10], %s1336_s26  ;;  %s1425_s30 = int_to_ptr.vmem [resolvable:$true] %s736_s30 }
 0x287   : > { %s1072_s25 = scalar_lea.vmem %s1425_s30, 32  ;;  %s1164_s8 = smov [#allocation9]  }
 0x288   : > { %p1073_p10 = scmp.ne.s32.totalorder %s1425_s30, %s1072_s25  ;;  %s1076_s15 = sshll.u32 %s1164_s8, 4  ;;  %s1077_s15 = int_to_ptr.vmem [resolvable:$false] %s1076_s15 }
 0x289   : > { %s1078_s29 = scalar_lea.vmem %s1077_s15, 64  ;;  %p1079_p7 = scmp.lt.s32.totalorder %s1425_s30, %s1077_s15 }
 0x28a   : > { %p1074_p13 = pnand %p1073_p10, %p1291_p12  ;;  %p1080_p9 = scmp.lt.s32.totalorder %s1078_s29, %s1072_s25 }
 0x28c   : > { %p1075_p3 = pneg %p1074_p13  ;;  %p1081_p2 = por %p1080_p9, %p1079_p7 }
 0x28e   : > { %p1082_p5 = pnand %p1081_p2, %p1075_p3 }
 0x301   : > { %v691_v8 = vpop.xlane.xlu0 %690 }
 0x303   : > { %v698_v9 = vpop.xlane.xlu1 %697 }
 0x304   : > { %v700_v10 = vsel %vm699_vm11, %v691_v8, %v698_v9 }
 0x305   : > { %702 = vst.msk [vmem:[%s293_s7] sm:$0x3] %vm701_vm12, %v700_v10 }
 0x306   : > { %1085 = shalt.err (!%p1082_p5)
}
 0x307   : > { %s1086_s26 = scalar_lea.hbm %s1423_s17, 32  ;;  %s1090_s10 = scalar_lea.hbm %s1473_s6, 64 }
 0x308   : > { %p1087_p0 = scmp.ne.s32.totalorder %s1423_s17, %s1086_s26  ;;  %p1091_p4 = scmp.lt.u32.totalorder %s1423_s17, %s1473_s6 }
 0x309   : > { %p1092_p6 = scmp.lt.u32.totalorder %s1090_s10, %s1086_s26  ;;  %p1094_p10 = scmp.lt.u32.totalorder %s1086_s26, %s1423_s17 }
 0x30a   : > { %p1088_p1 = pnand %p1087_p0, %p1291_p12 }
 0x30b   : > { %p1093_p8 = por %p1092_p6, %p1091_p4 }
 0x30c   : > { %p1089_p11 = pneg %p1088_p1 }
 0x30d   : > { %p1095_p13 = por %p1094_p10, %p1093_p8 }
 0x30f   : > { %p1096_p3 = pnand %p1095_p13, %p1089_p11 }
 0x311   : > { %1099 = shalt.err (!%p1096_p3)
}
 0x312   : > { %904 = dma.vmem_to_hbm [thread:$0]  (%p1291_p12), %s1425_s30, 32, %s1423_s17, %s709_s20  }
 0x313 PF: > { %s748_s7 = sand.u32 1, %s1134_s21   ;;  %p1488_p7 = scmp.ne.s32.totalorder %s1478_s28, 0 }
 0x314   : > { %p1489_p9 = scmp.ge.s32.totalorder %s1146_s24, 2  ;;  %s749_s12 = scalar_lea.sflag [#allocation5], %s748_s7 }
 0x316   : > { %p916_p2 = pnand %p1489_p9, %p1488_p7 }
 0x318   : > { %1125 = dma.done.wait (!%p916_p2), %s749_s12, 64  }
 0x319   : > { %1127 = vsyncadd (!%p916_p2), %s749_s12, 4294967232  ;;  %s758_s16 = scalar_lea.sflag [#allocation10], %s748_s7 }
 0x31a   : > { %1129 = dma.done.wait (!%p916_p2), %s758_s16, 32  }
 0x31b   : > { %1131 = vsyncadd (!%p916_p2), %s758_s16, 4294967264  ;;  %p24_p12 = scmp.ge.s32.totalorder %s1256_s9, 4   ;;  %s1490_s21 = smov %s1138_s22 }
 0x31c   : > { %s1491_s22 = smov %s1142_s23  ;;  %s1492_s23 = smov %s1287_s13 }
 0x31d   : > { %s1493_s24 = smov %s1256_s9  ;;  %26 = sbr.rel (!%p24_p12) target bundleno = 8 (0x8), region = 106 }
 0x324   :  { %763 = vsyncpa [#allocation4], 1 }
 0x325   :  { %765 = vsyncpa [#allocation4 + $0x1], 1 }
 0x326   :  { %766 = vsyncpa [#allocation7], 1 }
 0x327   :  { %767 = vsyncpa [#allocation5], 1 }
 0x328   :  { %769 = vsyncpa [#allocation5 + $0x1], 1 }
 0x329   :  { %770 = vsyncpa [#allocation10], 1 }
 0x32a   :  { %772 = vsyncpa [#allocation10 + $0x1], 1 }

</bundles_post_ra>
